<compile_context>
chip_gen: v7x
topology: tpu7x:2x2x1
jax: 0.10.0
libtpu: 0.0.40
codegen_flags: <defaults>
</compile_context>

<pallas_src>
import jax
import jax.numpy as jnp
from jax.experimental import pallas as pl
from jax.experimental.pallas import tpu as pltpu


_TILE_BYTES = 4 * 1024 * 1024   # target size of one streamed x tile
_TN_MAX = 32768                 # hard cap on lanes (rows) per grid step
_VMEM_LIMIT = 40 * 1024 * 1024  # scoped VMEM budget; safe on v5e/v6e/v7x


def _choose_tile(n_rows, c, itemsize):
    """Rows per grid step: multiple of 128, large, >=2 grid steps when possible."""
    tn_cap = (_TILE_BYTES // max(1, itemsize * c)) // 128 * 128
    tn_cap = max(128, min(_TN_MAX, tn_cap))
    if n_rows <= 128:
        return 128
    tn_half = (-(-n_rows // 2) + 127) // 128 * 128  # ceil(N/2) rounded up to 128
    return max(128, min(tn_cap, tn_half))


def _logits_sigmoid(x_ref, w_ref, b_ref):
    """Per-tile sigmoid(x @ w + b) as a lane-dense (1, TN) row."""
    x = x_ref[...]                          # (TN, C), native layout
    if x.dtype != jnp.float32:
        x = x.astype(jnp.float32)           # upcast in-vreg; HBM stream stays narrow
    # (8, C) x (TN, C)^T -> (8, TN) on the MXU (idle otherwise); all 8 rows of w
    # are identical, keep row 0.  Output row is lane-dense.
    z = jnp.einsum("kc,nc->kn", w_ref[...], x,
                   preferred_element_type=jnp.float32)[0:1, :] + b_ref[0]
    return 1.0 / (1.0 + jnp.exp(-z))        # sigmoid, (1, TN)


def _make_pred_kernel(n_valid, tn):
    def kernel(x_ref, w_ref, b_ref, pred_ref):
        p = _logits_sigmoid(x_ref, w_ref, b_ref)
        col = pl.program_id(0) * tn + jax.lax.broadcasted_iota(jnp.int32, (1, tn), 1)
        pred_ref[...] = jnp.where(col < n_valid, p, 0.0).astype(pred_ref.dtype)
    return kernel


def _make_train_kernel(n_valid, tn):
    def kernel(x_ref, w_ref, b_ref, vis_ref, loss_ref):
        p = _logits_sigmoid(x_ref, w_ref, b_ref)
        t = vis_ref[...]
        # BCEWithLogitsLoss(reduction='none') applied to the *sigmoided*
        # prediction (module quirk, replicated faithfully).
        loss = jnp.maximum(p, 0.0) - p * t + jnp.log(1.0 + jnp.exp(-jnp.abs(p)))
        col = pl.program_id(0) * tn + jax.lax.broadcasted_iota(jnp.int32, (1, tn), 1)
        loss_ref[...] = jnp.where(col < n_valid, loss, 0.0).astype(loss_ref.dtype)
    return kernel


def visibility_classifier_forward(x, weight, bias, vis=None, return_loss=True):
    """x: (B, landmark_num, C); weight: (1, C) or (C,); bias: (1,); vis: (B, landmark_num)."""
    B, L, C = x.shape
    N = B * L
    if x.dtype not in (jnp.float32, jnp.bfloat16):
        x = x.astype(jnp.float32)
    x2d = x.reshape(N, C)                                   # contiguous, no HBM pass

    TN = _choose_tile(N, C, jnp.dtype(x.dtype).itemsize)
    num_blocks = -(-N // TN)
    N_out = num_blocks * TN
    grid = (num_blocks,)

    w8 = jnp.broadcast_to(jnp.asarray(weight, jnp.float32).reshape(1, C), (8, C))
    b1 = jnp.asarray(bias, jnp.float32).reshape(-1)[:1]     # (1,) scalar -> SMEM

    x_spec = pl.BlockSpec((TN, C), lambda j: (j, 0))
    w_spec = pl.BlockSpec((8, C), lambda j: (0, 0))
    b_spec = pl.BlockSpec(memory_space=pltpu.MemorySpace.SMEM)
    row_spec = pl.BlockSpec((1, TN), lambda j: (0, j))
    cparams = pltpu.CompilerParams(
        dimension_semantics=("parallel",),
        vmem_limit_bytes=_VMEM_LIMIT,
    )

    if not return_loss:
        pred_pad = pl.pallas_call(
            _make_pred_kernel(N, TN),
            out_shape=jax.ShapeDtypeStruct((1, N_out), jnp.float32),
            grid=grid,
            in_specs=[x_spec, w_spec, b_spec],
            out_specs=row_spec,
            compiler_params=cparams,
        )(x2d, w8, b1)
        return pred_pad[0, :N].reshape(B, L)

    vis_f = jnp.asarray(vis, jnp.float32)
    vis_row = jnp.pad(vis_f.reshape(1, N), ((0, 0), (0, N_out - N)))  # tiny

    loss_pad = pl.pallas_call(
        _make_train_kernel(N, TN),
        out_shape=jax.ShapeDtypeStruct((1, N_out), jnp.float32),
        grid=grid,
        in_specs=[x_spec, w_spec, b_spec, row_spec],
        out_specs=row_spec,
        compiler_params=cparams,
    )(x2d, w8, b1, vis_row)

    loss_elems = loss_pad[0, :N].reshape(B, L)                      # (B, L)
    loss_mean_per_lm = jnp.mean(loss_elems, axis=1, keepdims=True)  # (B, 1)
    loss_scalar = jnp.mean(loss_mean_per_lm)                        # scalar
    # Faithful to the original module: forward_train stacks lm_vis, not vis_pred.
    vis_pred_list = vis_f                                           # (B, L)
    return loss_scalar, vis_pred_list


if __name__ == "__main__":
    B, L, C = 2, 8, 32  # batch, landmark_num, inchannels
    key = jax.random.PRNGKey(0)
    kx, kw, kv = jax.random.split(key, 3)
    x = jax.random.normal(kx, (B, L, C), dtype=jnp.float32)
    weight = 0.1 * jax.random.normal(kw, (1, C), dtype=jnp.float32)   # nn.Linear(C, 1).weight
    bias = jnp.full((1,), 0.01, dtype=jnp.float32)                    # nn.Linear(C, 1).bias
    vis = (jax.random.uniform(kv, (B, L)) > 0.5).astype(jnp.float32)

    # --- forward_test path (return_loss=False) ---
    pred = visibility_classifier_forward(x, weight, bias, return_loss=False)
    pred = jax.block_until_ready(pred)

    ref_pred = jax.nn.sigmoid(jnp.einsum("blc,oc->blo", x, weight)[..., 0] + bias[0])
    assert pred.shape == (B, L)
    assert jnp.allclose(pred, ref_pred, atol=1e-5, rtol=1e-5)

    # --- forward_train path (return_loss=True) ---
    loss, vis_pred_list = visibility_classifier_forward(
        x, weight, bias, vis=vis, return_loss=True
    )
    loss = jax.block_until_ready(loss)

    p = ref_pred
    ref_loss_elems = jnp.maximum(p, 0.0) - p * vis + jnp.log(1.0 + jnp.exp(-jnp.abs(p)))
    ref_loss = jnp.mean(jnp.mean(ref_loss_elems, axis=1, keepdims=True))
    assert jnp.allclose(loss, ref_loss, atol=1e-5, rtol=1e-5)
    assert jnp.allclose(vis_pred_list, vis)

    print("KERNEL_OK")
</pallas_src>

<mosaic_0001>
module attributes {stable_mosaic.version = 11 : i64} {
  func.func @kernel(%arg0: i32, %arg1: memref<128x32xf32, #tpu.memory_space<vmem>>, %arg2: memref<8x32xf32, #tpu.memory_space<vmem>>, %arg3: memref<1xf32, #tpu.memory_space<smem>>, %arg4: memref<1x128xf32, #tpu.memory_space<vmem>>) attributes {dimension_semantics = [#tpu.dimension_semantics<parallel>], iteration_bounds = array<i64: 1>, scalar_prefetch = 0 : i64, scratch_operands = 0 : i64, tpu.core_type = #tpu.core_type<tc>, window_params = [{transform_indices = @transform_0, window_bounds = array<i64: 128, 32>}, {pipeline_mode = #tpu.pipeline_mode<synchronous>, transform_indices = @transform_1, window_bounds = array<i64: 8, 32>}, {transform_indices = @transform_2, window_bounds = array<i64: 1>}, {transform_indices = @transform_3, window_bounds = array<i64: 1, 128>}]} {
    %c0 = arith.constant 0 : index
    %c0_0 = arith.constant 0 : index
    %0 = vector.load %arg1[%c0, %c0_0] : memref<128x32xf32, #tpu.memory_space<vmem>>, vector<128x32xf32>
    %c0_1 = arith.constant 0 : index
    %c0_2 = arith.constant 0 : index
    %1 = vector.load %arg2[%c0_1, %c0_2] : memref<8x32xf32, #tpu.memory_space<vmem>>, vector<8x32xf32>
    "tpu.trace_start"() <{level = 10 : i32, message = "kc,nc->kn"}> : () -> ()
    %cst = arith.constant dense<0.000000e+00> : vector<8x128xf32>
    %2 = tpu.matmul %1, %0, %cst {dimension_numbers = #tpu.dot_dimension_numbers<[1], [1], [0], [0], [0, 0, 1, 0], [], []>} : vector<8x32xf32>, vector<128x32xf32>, vector<8x128xf32> -> vector<8x128xf32>
    "tpu.trace_stop"() : () -> ()
    %3 = vector.extract_strided_slice %2 {offsets = [0, 0], sizes = [1, 128], strides = [1, 1]} : vector<8x128xf32> to vector<1x128xf32>
    %c0_3 = arith.constant 0 : index
    %4 = memref.load %arg3[%c0_3] : memref<1xf32, #tpu.memory_space<smem>>
    %5 = vector.broadcast %4 : f32 to vector<1x128xf32>
    %6 = arith.addf %3, %5 : vector<1x128xf32>
    %cst_4 = arith.constant 0.000000e+00 : f32
    %7 = vector.broadcast %cst_4 : f32 to vector<1x128xf32>
    %8 = arith.subf %7, %6 : vector<1x128xf32>
    %9 = math.exp %8 : vector<1x128xf32>
    %cst_5 = arith.constant 1.000000e+00 : f32
    %10 = vector.broadcast %cst_5 : f32 to vector<1x128xf32>
    %11 = arith.addf %10, %9 : vector<1x128xf32>
    %cst_6 = arith.constant 1.000000e+00 : f32
    %12 = vector.broadcast %cst_6 : f32 to vector<1x128xf32>
    %13 = arith.divf %12, %11 : vector<1x128xf32>
    %c128_i32 = arith.constant 128 : i32
    %14 = arith.muli %arg0, %c128_i32 : i32
    %15 = tpu.iota {dimensions = array<i32: 1>} : vector<1x128xi32>
    %16 = vector.broadcast %14 : i32 to vector<1x128xi32>
    %17 = arith.addi %16, %15 : vector<1x128xi32>
    %c16_i32 = arith.constant 16 : i32
    %18 = vector.broadcast %c16_i32 : i32 to vector<1x128xi32>
    %19 = arith.cmpi slt, %17, %18 : vector<1x128xi32>
    %cst_7 = arith.constant 0.000000e+00 : f32
    %20 = vector.broadcast %cst_7 : f32 to vector<1x128xf32>
    %21 = arith.select %19, %13, %20 : vector<1x128xi1>, vector<1x128xf32>
    %c0_8 = arith.constant 0 : index
    %c0_9 = arith.constant 0 : index
    %22 = vector.load %arg4[%c0_8, %c0_9] : memref<1x128xf32, #tpu.memory_space<vmem>>, vector<1x128xf32>
    tpu.vector_store %arg4[%c0_8, %c0_9], %21 {strides = array<i32>} : memref<1x128xf32, #tpu.memory_space<vmem>>, vector<1x128xf32>,
    return
  }
  func.func @transform_0(%arg0: i32) -> (i32, i32) {
    %c0_i32 = arith.constant 0 : i32
    %c0_i32_0 = arith.constant 0 : i32
    return %arg0, %c0_i32 : i32, i32
  }
  func.func @transform_1(%arg0: i32) -> (i32, i32) {
    %c0_i32 = arith.constant 0 : i32
    %c0_i32_0 = arith.constant 0 : i32
    %c0_i32_1 = arith.constant 0 : i32
    return %c0_i32, %c0_i32_0 : i32, i32
  }
  func.func @transform_2(%arg0: i32) -> i32 {
    %c0_i32 = arith.constant 0 : i32
    %c0_i32_0 = arith.constant 0 : i32
    return %c0_i32 : i32
  }
  func.func @transform_3(%arg0: i32) -> (i32, i32) {
    %c0_i32 = arith.constant 0 : i32
    %c0_i32_0 = arith.constant 0 : i32
    return %c0_i32, %arg0 : i32, i32
  }
}

</mosaic_0001>

<bundles_post_ra>
// kernel: tpu_custom_call.1
= control target key start
LH: loop header
LB: loop body
LE: loop exit
PB: predicated region body
PF: predicated region fallthrough
CT: control target
= control target key end

     0   :  { %9 = vsyncpa [#allocation4], 0  ;;  %s489_s0 = inlined_call_operand.hbm [shape: f32[16,32], index: 0, kind: input, shape index: {}]   ;;  %s490_s1 = inlined_call_operand.hbm [shape: f32[8,32], index: 1, kind: input, shape index: {}]   ;;  %s491_s2 = inlined_call_operand.<no memory space> [shape: f32[1], index: 2, kind: input, shape index: {}]   ;;  %s492_s3 = inlined_call_operand.hbm [shape: f32[1,128], index: 3, kind: output, shape index: {}]  }
   0x1   :  { %10 = vsyncpa [#allocation7], 0 }
   0x2   :  { %11 = vsyncpa [#allocation5], 0 }
   0x3   :  { %16 = vsyncadd [#allocation4], 1792  ;;  %s399_s12 = smov [#allocation3]   ;;  %s327_s16 = scalar_lea.hbm %s489_s0, 256 }
   0x4   :  { %s17_s13 = sshll.u32 %s399_s12, 4  ;;  %p328_p0 = scmp.ne.s32.totalorder %s489_s0, %s327_s16  ;;  %s18_s13 = int_to_ptr.vmem [resolvable:$true] %s17_s13 }
   0x5   :  { %p331_p1 = scmp.lt.u32.totalorder %s327_s16, %s489_s0 }
   0x7   :  { %p333_p2 = pnand %p331_p1, %p328_p0 }
   0x9   :  { %336 = shalt.err (!%p333_p2)
}
   0xa   :  { %s337_s21 = scalar_lea.vmem %s18_s13, 256  ;;  %s341_s22 = scalar_lea.vmem %s18_s13, 2048 }
   0xb   :  { %p338_p3 = scmp.ne.s32.totalorder %s18_s13, %s337_s21  ;;  %p342_p4 = scmp.lt.s32.totalorder %s18_s13, %s18_s13 }
   0xc   :  { %p343_p5 = scmp.lt.s32.totalorder %s341_s22, %s337_s21 }
   0xe   :  { %p344_p6 = por %p343_p5, %p342_p4 }
  0x10   :  { %p345_p7 = pnand %p344_p6, %p338_p3 }
  0x12   :  { %348 = shalt.err (!%p345_p7)
}
  0x13   :  { %s400_s23 = smov 128   ;;  %s401_s24 = smov 8  }
  0x14   :  { %23 = dma.hbm_to_vmem [thread:$0]  %s489_s0, 256, %s18_s13, [#allocation4], %s400_s23, %s400_s23, %s401_s24  }
  0x15   :  { %s402_s27 = smov [#allocation6]   ;;  %s349_s4 = scalar_lea.hbm %s490_s1, 128 }
  0x16   :  { %s30_s28 = sshll.u32 %s402_s27, 4  ;;  %p350_p8 = scmp.ne.s32.totalorder %s490_s1, %s349_s4  ;;  %s31_s28 = int_to_ptr.vmem [resolvable:$true] %s30_s28 }
  0x17   :  { %p353_p9 = scmp.lt.u32.totalorder %s349_s4, %s490_s1 }
  0x19   :  { %p355_p10 = pnand %p353_p9, %p350_p8 }
  0x1b   :  { %358 = shalt.err (!%p355_p10)
}
  0x1c   :  { %s359_s9 = scalar_lea.vmem %s31_s28, 128  ;;  %p364_p12 = scmp.lt.s32.totalorder %s31_s28, %s31_s28 }
  0x1d   :  { %p360_p11 = scmp.ne.s32.totalorder %s31_s28, %s359_s9  ;;  %p365_p13 = scmp.lt.s32.totalorder %s359_s9, %s359_s9 }
  0x1f   :  { %p366_p0 = por %p365_p13, %p364_p12 }
  0x21   :  { %p367_p1 = pnand %p366_p0, %p360_p11 }
  0x23   :  { %370 = shalt.err (!%p367_p1)
}
  0x24   :  { %33 = dma.hbm_to_vmem [thread:$0]  %s490_s1, 128, %s31_s28, [#allocation7]  }
  0x25   :  { %393 = dma.done.wait [#allocation4], 2048  }
  0x26   :  { %394 = vsyncadd [#allocation4], 4294965248 }
  0x27   :  { %395 = dma.done.wait [#allocation7], 128  }
  0x28   :  { %396 = vsyncadd [#allocation7], 4294967168  ;;  %v403_v0 = vmov 0.0|0.0   ;;  %vm404_vm0 = vmmov 0   ;;  %v405_v1 = vmov 0.0   ;;  %vm59_vm1 = vcmask 261120  }
  0x29   :  { %283 = vmatprep.subr.bf16.mxu0 %v403_v0  ;;  %280 = vmatprep.mubr.msk.f32.mxu0 %vm404_vm0, %v405_v1  ;;  %v42_v2 = vld [vmem:[#allocation3] sm:$0xff]  ;;  %v43_v3 = vld [vmem:[#allocation3 + $0x8] sm:$0xff]  ;;  %vm453_vm2 = vmpackc.low %vm59_vm1, %vm59_vm1  ;;  %v182_v28 = vstv %s491_s2  ;;  %v191_v36 = vlaneseq  ;;  %s406_s12 = smov [#allocation8]  }
  0x2a   :  { %v284_v5 = vpack.c.bf16 %v43_v3, %v42_v2  ;;  %v44_v6 = vld [vmem:[#allocation3 + $0x10] sm:$0xff]  ;;  %v45_v7 = vld [vmem:[#allocation3 + $0x18] sm:$0xff]  ;;  %v46_v9 = vld [vmem:[#allocation3 + $0x20] sm:$0xff]  ;;  %s204_s13 = sshll.u32 %s406_s12, 4  ;;  %s205_s13 = int_to_ptr.vmem [resolvable:$true] %s204_s13 }
  0x2b   :  { %v288_v8 = vpack.c.bf16 %v45_v7, %v44_v6  ;;  %v47_v10 = vld [vmem:[#allocation3 + $0x28] sm:$0xff]  ;;  %v48_v12 = vld [vmem:[#allocation3 + $0x30] sm:$0xff]  ;;  %v49_v13 = vld [vmem:[#allocation3 + $0x38] sm:$0xff]  ;;  %v192_v37 = vand.u32 127, %v191_v36  ;;  %s371_s14 = scalar_lea.vmem %s205_s13, 16  ;;  %s375_s2 = scalar_lea.vmem %s205_s13, 32 }
  0x2c   :  { %286 = vmatpush3.bf16.xpose.msk.msra.mxu0 %vm453_vm2, %v284_v5  ;;  %v292_v11 = vpack.c.bf16 %v47_v10, %v46_v9  ;;  %v296_v14 = vpack.c.bf16 %v49_v13, %v48_v12  ;;  %v50_v15 = vld [vmem:[#allocation3 + $0x40] sm:$0xff]  ;;  %v51_v16 = vld [vmem:[#allocation3 + $0x48] sm:$0xff]  ;;  %v52_v18 = vld [vmem:[#allocation3 + $0x50] sm:$0xff]  ;;  %p372_p2 = scmp.ne.s32.totalorder %s205_s13, %s371_s14  ;;  %p376_p3 = scmp.lt.s32.totalorder %s205_s13, %s205_s13 }
  0x2d   :  { %287 = vmatprep.subr.bf16.mxu0 %v403_v0  ;;  %v300_v17 = vpack.c.bf16 %v51_v16, %v50_v15  ;;  %v53_v19 = vld [vmem:[#allocation3 + $0x58] sm:$0xff]  ;;  %v54_v21 = vld [vmem:[#allocation3 + $0x60] sm:$0xff]  ;;  %v55_v22 = vld [vmem:[#allocation3 + $0x68] sm:$0xff]  ;;  %vm195_vm3 = vcmp.lt.s32.totalorder %v192_v37, 16  ;;  %p377_p4 = scmp.lt.s32.totalorder %s375_s2, %s371_s14 }
  0x2e   :  { %v304_v20 = vpack.c.bf16 %v53_v19, %v52_v18  ;;  %v308_v23 = vpack.c.bf16 %v55_v22, %v54_v21  ;;  %v56_v24 = vld [vmem:[#allocation3 + $0x70] sm:$0xff]  ;;  %v57_v25 = vld [vmem:[#allocation3 + $0x78] sm:$0xff]  ;;  %v58_v27 = vld [vmem:[#allocation6] sm:$0xff] }
  0x2f   :  { %v312_v26 = vpack.c.bf16 %v57_v25, %v56_v24  ;;  %p378_p5 = por %p377_p4, %p376_p3 }
  0x31   :  { %p379_p6 = pnand %p378_p5, %p372_p2 }
  0x34   :  { %290 = vmatpush3.bf16.xpose.msk.msra.mxu0 %vm453_vm2, %v288_v8 }
  0x35   :  { %291 = vmatprep.subr.bf16.mxu0 %v403_v0 }
  0x3c   :  { %294 = vmatpush3.bf16.xpose.msk.msra.mxu0 %vm453_vm2, %v292_v11 }
  0x3d   :  { %295 = vmatprep.subr.bf16.mxu0 %v403_v0 }
  0x44   :  { %298 = vmatpush3.bf16.xpose.msk.msra.mxu0 %vm453_vm2, %v296_v14 }
  0x45   :  { %299 = vmatprep.subr.bf16.mxu0 %v403_v0 }
  0x4c   :  { %302 = vmatpush3.bf16.xpose.msk.msra.mxu0 %vm453_vm2, %v300_v17 }
  0x4d   :  { %303 = vmatprep.subr.bf16.mxu0 %v403_v0 }
  0x54   :  { %306 = vmatpush3.bf16.xpose.msk.msra.mxu0 %vm453_vm2, %v304_v20 }
  0x55   :  { %307 = vmatprep.subr.bf16.mxu0 %v403_v0 }
  0x5c   :  { %310 = vmatpush3.bf16.xpose.msk.msra.mxu0 %vm453_vm2, %v308_v23 }
  0x5d   :  { %311 = vmatprep.subr.bf16.mxu0 %v403_v0 }
  0x64   :  { %314 = vmatpush3.bf16.xpose.msk.msra.mxu0 %vm453_vm2, %v312_v26 }
  0x6b   :  { %281 = vmatmul.mubr.msk.f32.vlgmr.msra.gmra.mrb[0].mxu0 %vm59_vm1, %v58_v27 }
 0x13e   :  { %v177_v29 = vpop.f32.mrb[0].mxu0 }
 0x13f   :  { %v183_v30 = vadd.f32 %v182_v28, %v177_v29  ;;  %v282_v31 = vpop.f32.mrb[1].mxu0 }
 0x141   :  { %v184_v32 = vsub.f32 0.0, %v183_v30 }
 0x143   :  { %v185_v33 = vmul.f32 1.442695, %v184_v32 }
 0x145   :  { %323 = vpow2.f32 %v185_v33 }
 0x14f   :  { %v324_v34 = vpop.eup %323 }
 0x150   :  { %v187_v35 = vadd.f32 1.0, %v324_v34 }
 0x152   :  { %325 = vrcp.f32 %v187_v35 }
 0x15c   :  { %v326_v38 = vpop.eup %325 }
 0x15d   :  { %v196_v39 = vsel %vm195_vm3, %v326_v38, 0.0 }
 0x15e   :  { %197 = vst [vmem:[#allocation8] sm:$0x1] %v196_v39 }
 0x15f   :  { %382 = shalt.err (!%p379_p6)
}
 0x160   :  { %s383_s17 = scalar_lea.hbm %s492_s3, 16 }
 0x161   :  { %p384_p7 = scmp.ne.s32.totalorder %s492_s3, %s383_s17  ;;  %p387_p8 = scmp.lt.u32.totalorder %s383_s17, %s492_s3 }
 0x163   :  { %p389_p9 = pnand %p387_p8, %p384_p7 }
 0x165   :  { %392 = shalt.err (!%p389_p9)
}
 0x166   :  { %207 = dma.vmem_to_hbm [thread:$0]  %s205_s13, 16, %s492_s3, [#allocation5]  }
 0x167   :  { %397 = dma.done.wait [#allocation5], 16  }
 0x168   :  { %398 = vsyncadd [#allocation5], 4294967280 }
 0x169   :  { %211 = vsyncpa [#allocation4], 1 }
 0x16a   :  { %212 = vsyncpa [#allocation7], 1 }
 0x16b   :  { %213 = vsyncpa [#allocation5], 1 }

</bundles_post_ra>
